<compile_context>
chip_gen: v7x
topology: tpu7x:2x2x1
jax: 0.10.0
libtpu: 0.0.40
codegen_flags: <defaults>
</compile_context>

<pallas_src>
import jax
import jax.numpy as jnp
from jax import lax
from jax.experimental import pallas as pl
from jax.experimental.pallas import tpu as pltpu


def _sblock_kernel(alpha_ref, p_ref, w_ref, o_ref):
    # alpha_ref : SMEM (1,)        shared PReLU alpha (scalar prefetch)
    # p_ref     : VMEM (K, tM)     im2col patches (+ ones row for the bias)
    # w_ref     : VMEM (Cout, K)   conv weights, tap-major, bias folded as last column
    # o_ref     : VMEM (Cout, tM)  conv+bias+PReLU output, lane dim = tM (lane dense)
    acc = jnp.dot(w_ref[...], p_ref[...],
                  preferred_element_type=jnp.float32)          # (Cout, tM) on the MXU
    alpha = alpha_ref[0]
    o_ref[...] = jnp.where(acc >= 0, acc, alpha * acc).astype(o_ref.dtype)


def _choose_m_tile(M, cap):
    """Largest lane tile <= cap that is a multiple of 128 and divides M."""
    if M <= cap:
        return M
    for t in range(cap - cap % 128, 0, -128):
        if M % t == 0:
            return t
    return M  # fall back to a single full-extent tile


def sblock_forward(x_nchw, weight, bias, alpha, up_scale, *,
                   use_bf16=False, m_tile_cap=2048):
    """x_nchw: (N, Cin, H, W); weight: (Cout, Cin, 3, 3); bias: (Cout,);
    alpha: scalar PReLU parameter. Returns (N, Cin, H*r, W*r) like PyTorch."""
    N, Cin, H, W = x_nchw.shape
    Cout = weight.shape[0]
    r = up_scale
    assert Cout == Cin * r * r
    M = H * W
    K = 9 * Cin + 1  # 9 taps * Cin channels + 1 ones-row (bias)

    # ---- im2col, one pass in the wrapper (tap-major, channel-minor K order).
    x_pad = jnp.pad(x_nchw, ((0, 0), (0, 0), (1, 1), (1, 1)))
    taps = [x_pad[:, :, kh:kh + H, kw:kw + W]
            for kh in range(3) for kw in range(3)]             # 9 x (N, Cin, H, W)
    P = jnp.stack(taps, axis=1).reshape(N, 9 * Cin, M)         # (N, 9*Cin, H*W)
    P = jnp.concatenate([P, jnp.ones((N, 1, M), P.dtype)], axis=1)   # (N, K, M)

    # ---- weights: (Cout, Cin, 3, 3) -> (Cout, 9*Cin) tap-major, + bias column.
    Wm = jnp.transpose(weight, (0, 2, 3, 1)).reshape(Cout, 9 * Cin)
    Wm = jnp.concatenate([Wm, bias.reshape(Cout, 1).astype(Wm.dtype)], axis=1)

    if use_bf16:  # bf16 operands, f32 accumulate + f32 PReLU in-kernel
        P = P.astype(jnp.bfloat16)
        Wm = Wm.astype(jnp.bfloat16)

    alpha_arr = jnp.asarray(alpha, jnp.float32).reshape(1)

    tM = _choose_m_tile(M, m_tile_cap)
    grid = (N, M // tM)

    conv = pl.pallas_call(
        _sblock_kernel,
        out_shape=jax.ShapeDtypeStruct((N, Cout, M), x_nchw.dtype),
        grid_spec=pltpu.PrefetchScalarGridSpec(
            num_scalar_prefetch=1,           # alpha -> SMEM
            grid=grid,
            in_specs=[
                # patches: one batch element, one lane tile of M per step
                pl.BlockSpec((None, K, tM), lambda n, m, a: (n, 0, m)),
                # weights: whole (Cout, K) matrix, resident every step
                pl.BlockSpec((Cout, K), lambda n, m, a: (0, 0)),
            ],
            out_specs=pl.BlockSpec((None, Cout, tM), lambda n, m, a: (n, 0, m)),
        ),
        compiler_params=pltpu.CompilerParams(
            dimension_semantics=("parallel", "parallel")),
    )(alpha_arr, P, Wm)

    # PixelShuffle glue: conv is already NCHW-flat -> only the shuffle permutation
    # remains (PReLU already applied in-kernel; valid because alpha is a scalar).
    y = conv.reshape(N, Cin, r, r, H, W)
    y = jnp.transpose(y, (0, 1, 4, 2, 5, 3)).reshape(N, Cin, H * r, W * r)
    return y


def _reference(x_nchw, weight, bias, alpha, up_scale):
    """Plain-JAX reference mirroring PyTorch semantics exactly."""
    N, Cin, H, W = x_nchw.shape
    r = up_scale
    y = lax.conv_general_dilated(
        x_nchw, weight, window_strides=(1, 1), padding=((1, 1), (1, 1)),
        dimension_numbers=("NCHW", "OIHW", "NCHW"))
    y = y + bias.reshape(1, -1, 1, 1)
    y = y.reshape(N, Cin, r, r, H, W)
    y = jnp.transpose(y, (0, 1, 4, 2, 5, 3)).reshape(N, Cin, H * r, W * r)
    return jnp.where(y >= 0, y, alpha * y)


if __name__ == "__main__":
    # Shapes consistent with the module: batch=2, in_channels=4, spatial=16x16,
    # up_scale=2 -> conv out channels = 4 * 2^2 = 16.
    N, Cin, H, W = 2, 4, 16, 16
    up_scale = 2
    Cout = Cin * up_scale ** 2

    key = jax.random.PRNGKey(0)
    kx, kw, kb = jax.random.split(key, 3)
    x = jax.random.normal(kx, (N, Cin, H, W), jnp.float32)
    weight = jax.random.normal(kw, (Cout, Cin, 3, 3), jnp.float32) * 0.1
    bias = jax.random.normal(kb, (Cout,), jnp.float32) * 0.1
    alpha = jnp.float32(0.25)   # PyTorch PReLU default init

    ref = _reference(x, weight, bias, alpha, up_scale)

    # f32 path (exact module semantics)
    out = sblock_forward(x, weight, bias, alpha, up_scale)
    out = jax.block_until_ready(out)
    assert out.shape == (N, Cin, H * up_scale, W * up_scale)
    assert jnp.allclose(out, ref, atol=1e-4, rtol=1e-4)

    # bf16-operand fast path (f32 accumulate) -- looser tolerance
    out_bf16 = sblock_forward(x, weight, bias, alpha, up_scale, use_bf16=True)
    out_bf16 = jax.block_until_ready(out_bf16)
    assert jnp.allclose(out_bf16, ref, atol=5e-2, rtol=5e-2)

    print("KERNEL_OK")
</pallas_src>

<mosaic_0001>
module attributes {stable_mosaic.version = 11 : i64} {
  func.func @_sblock_kernel(%arg0: i32, %arg1: i32, %arg2: memref<1xf32, #tpu.memory_space<smem>>, %arg3: memref<1x37x256xf32, #tpu.memory_space<vmem>>, %arg4: memref<16x37xf32, #tpu.memory_space<vmem>>, %arg5: memref<1x16x256xf32, #tpu.memory_space<vmem>>) attributes {dimension_semantics = [#tpu.dimension_semantics<parallel>, #tpu.dimension_semantics<parallel>], iteration_bounds = array<i64: 2, 1>, scalar_prefetch = 1 : i64, scratch_operands = 0 : i64, tpu.core_type = #tpu.core_type<tc>, window_params = [{transform_indices = @transform_0, window_bounds = array<i64: 1, 37, 256>}, {pipeline_mode = #tpu.pipeline_mode<synchronous>, transform_indices = @transform_1, window_bounds = array<i64: 16, 37>}, {transform_indices = @transform_2, window_bounds = array<i64: 1, 16, 256>}]} {
    %c0 = arith.constant 0 : index
    %c0_0 = arith.constant 0 : index
    %0 = vector.load %arg4[%c0, %c0_0] : memref<16x37xf32, #tpu.memory_space<vmem>>, vector<16x37xf32>
    %c0_1 = arith.constant 0 : index
    %c0_2 = arith.constant 0 : index
    %c0_3 = arith.constant 0 : index
    %1 = vector.load %arg3[%c0_1, %c0_2, %c0_3] : memref<1x37x256xf32, #tpu.memory_space<vmem>>, vector<1x37x256xf32>
    %2 = vector.shape_cast %1 : vector<1x37x256xf32> to vector<37x256xf32>
    %cst = arith.constant dense<0.000000e+00> : vector<16x256xf32>
    %3 = tpu.matmul %0, %2, %cst {dimension_numbers = #tpu.dot_dimension_numbers<[1], [0], [0], [1], [0, 0, 1, 1], [], []>} : vector<16x37xf32>, vector<37x256xf32>, vector<16x256xf32> -> vector<16x256xf32>
    %c0_4 = arith.constant 0 : index
    %4 = memref.load %arg2[%c0_4] : memref<1xf32, #tpu.memory_space<smem>>
    %cst_5 = arith.constant 0.000000e+00 : f32
    %5 = vector.broadcast %cst_5 : f32 to vector<16x256xf32>
    %6 = arith.cmpf oge, %3, %5 : vector<16x256xf32>
    %7 = vector.broadcast %4 : f32 to vector<16x256xf32>
    %8 = arith.mulf %7, %3 : vector<16x256xf32>
    %9 = arith.select %6, %3, %8 : vector<16x256xi1>, vector<16x256xf32>
    %c0_6 = arith.constant 0 : index
    %c0_7 = arith.constant 0 : index
    %c0_8 = arith.constant 0 : index
    %10 = vector.load %arg5[%c0_6, %c0_7, %c0_8] : memref<1x16x256xf32, #tpu.memory_space<vmem>>, vector<1x16x256xf32>
    %11 = vector.shape_cast %10 : vector<1x16x256xf32> to vector<16x256xf32>
    %12 = vector.shape_cast %9 : vector<16x256xf32> to vector<1x16x256xf32>
    tpu.vector_store %arg5[%c0_6, %c0_7, %c0_8], %12 {strides = array<i32>} : memref<1x16x256xf32, #tpu.memory_space<vmem>>, vector<1x16x256xf32>,
    return
  }
  func.func @transform_0(%arg0: i32, %arg1: i32, %arg2: memref<1xf32, #tpu.memory_space<smem>>) -> (i32, i32, i32) {
    %c0_i32 = arith.constant 0 : i32
    %c0_i32_0 = arith.constant 0 : i32
    return %arg0, %c0_i32, %arg1 : i32, i32, i32
  }
  func.func @transform_1(%arg0: i32, %arg1: i32, %arg2: memref<1xf32, #tpu.memory_space<smem>>) -> (i32, i32) {
    %c0_i32 = arith.constant 0 : i32
    %c0_i32_0 = arith.constant 0 : i32
    %c0_i32_1 = arith.constant 0 : i32
    return %c0_i32, %c0_i32_0 : i32, i32
  }
  func.func @transform_2(%arg0: i32, %arg1: i32, %arg2: memref<1xf32, #tpu.memory_space<smem>>) -> (i32, i32, i32) {
    %c0_i32 = arith.constant 0 : i32
    %c0_i32_0 = arith.constant 0 : i32
    return %arg0, %c0_i32, %arg1 : i32, i32, i32
  }
}

</mosaic_0001>

<bundles_post_ra>
// kernel: tpu_custom_call.1
= control target key start
LH: loop header
LB: loop body
LE: loop exit
PB: predicated region body
PF: predicated region fallthrough
CT: control target
= control target key end

     0   :  { %s709_s0 = inlined_call_operand.<no memory space> [shape: f32[1], index: 0, kind: input, shape index: {}]   ;;  %s710_s1 = inlined_call_operand.vmem [shape: f32[2,37,256], index: 1, kind: input, shape index: {}]   ;;  %s711_s2 = inlined_call_operand.vmem [shape: f32[16,37], index: 2, kind: input, shape index: {}]   ;;  %s712_s3 = inlined_call_operand.hbm [shape: f32[2,16,256], index: 3, kind: output, shape index: {}]  }
   0x1   :  { %8 = sst [smem:[#allocation3]] %s709_s0 }
   0x2   :  { %9 = vsyncpa [#allocation5], 0 }
   0x3   :  { %11 = vsyncpa [#allocation5 + $0x1], 0  ;;  %s588_s14 = smov 0   ;;  %s590_s15 = smov 0  }
   0x4   :  { %s592_s16 = smov 0   ;;  %s594_s17 = smov 0  }
   0x5   :  { %s596_s18 = smov 0   ;;  %s598_s19 = smov 0  }
   0x6 LB: > { %s391_s0 = sadd.s32 4294967295, %s559_s19   ;;  %s392_s20 = sadd.s32 4294967294, %s559_s19   ;;  %s559_s19 = sphi %s598_s19, %s17_s19   ;;  %s555_s18 = sphi %s596_s18, %s719_s18   ;;  %s551_s17 = sphi %s594_s17, %s718_s17   ;;  %s547_s16 = sphi %s592_s16, %s717_s16   ;;  %s543_s15 = sphi %s590_s15, %s716_s15   ;;  %s539_s14 = sphi %s588_s14, %s715_s14  }
   0x7   : > { %s29_s21 = sadd.s32 1, %s555_s18  ;;  %s87_s22 = sadd.s32 1, %s547_s16 }
   0x8   : > { %p31_p0 = scmp.ge.s32.totalorder %s29_s21, 2  ;;  %p97_p1 = scmp.ne.s32.totalorder %s547_s16, %s543_s15 }
   0x9   : > { %p98_p2 = scmp.eq.s32.totalorder %s391_s0, 1  ;;  %p103_p3 = scmp.ne.s32.totalorder %s543_s15, %s539_s14 }
   0xa   : > { %s721_s21 = smov (%p31_p0, %s29_s21), 0  ;;  %p104_p5 = scmp.eq.s32.totalorder %s392_s20, 1 }
   0xb   : > { %p628_p4 = por %p98_p2, %p97_p1  ;;  %s82_s24 = ssub.s32 %s555_s18, %s721_s21 }
   0xc   : > { %p395_p6 = scmp.ge.s32.totalorder %s559_s19, 1  ;;  %p85_p7 = scmp.eq.s32.totalorder %s82_s24, 0 }
   0xd   : > { %p635_p8 = por %p104_p5, %p103_p3  ;;  %p138_p9 = scmp.lt.s32.totalorder %s559_s19, 3 }
   0xe   : > { %s641_s26 = scalar_select %p85_p7, %s547_s16, %s87_s22  }
   0xf   : > { %p139_p10 = pnand %p395_p6, %p138_p9 }
  0x10   : > { %p165_p11 = scmp.lt.s32.totalorder (!%p139_p10), %s551_s17, 1  ;;  %v561_v0 = vmov (!%p139_p10), 0.0   ;;  %vm194_vm0 = vcmask (!%p139_p10), 1044480   ;;  %v175_v15 = vld [vmem:[%s711_s2] sm:$0xff] (!%p139_p10)  ;;  %vm187_vm1 = vcmask (!%p139_p10), 302080   ;;  %v176_v16 = vld [vmem:[%s711_s2 + $0x8] sm:$0xff] (!%p139_p10) }
  0x11   : > { %142 = sbr.rel (%p139_p10) target bundleno = 273 (0x111), region = 28  ;;  %265 = vmatprep.mubr.f32.mxu0 (!%p139_p10), %v561_v0  ;;  %271 = vmatprep.mubr.f32.mxu1 (!%p139_p10), %v561_v0  ;;  %s161_s9 = sand.u32 (!%p139_p10), 1, %s543_s15  }
  0x12   : > { %s278_s10 = sld [smem:[#allocation3]] (!%p139_p10)  ;;  %s396_s11 = sshll.u32 (!%p139_p10), %s161_s9, 5 }
  0x13   : > { %s163_s12 = scalar_lea.vmem (!%p139_p10), [#allocation4], %s396_s11  ;;  %s407_s0 = sshll.u32 (!%p139_p10), %s551_s17, 9 }
  0x14   : > { %s312_s13 = sshll.u32 (!%p139_p10), %s163_s12, 4  ;;  %s663_s24 = scalar_lea.sflag (!%p139_p10), [#allocation5], %s161_s9  ;;  %s656_s13 = int_to_ptr.vmem [resolvable:$true] %s312_s13 }
  0x18   : > { %s166_s27 = scalar_select %p165_p11, %s551_s17, 1  ;;  %v283_v17 = vstv %s278_s10 }
  0x19   : > { %s661_s17 = scalar_lea.hbm %s712_s3, %s407_s0 }
  0x1a   : > { %s422_s28 = smul.u32 80, %s166_s27  ;;  %s481_s27 = scalar_lea.vmem %s656_s13, 512 }
  0x1b   : > { %p482_p12 = scmp.ne.s32.totalorder %s656_s13, %s481_s27 }
  0x1c   : > { %s172_s4 = scalar_lea.vmem %s710_s1, %s422_s28  ;;  %s562_s28 = smov [#allocation4]  }
  0x1d   : > { %v178_v1 = vld [vmem:[%s172_s4 + $0x8] sm:$0xff]  ;;  %v180_v2 = vld [vmem:[%s172_s4 + $0x18] sm:$0xff]  ;;  %v177_v3 = vld [vmem:[%s172_s4] sm:$0xff]  ;;  %p483_p13 = pnand %p482_p12, %p628_p4  ;;  %s485_s29 = sshll.u32 %s562_s28, 4  ;;  %s486_s29 = int_to_ptr.vmem [resolvable:$false] %s485_s29 }
  0x1e   : > { %v408_v4 = vpack.c.bf16 %v180_v2, %v178_v1  ;;  %v179_v5 = vld [vmem:[%s172_s4 + $0x10] sm:$0xff]  ;;  %v182_v6 = vld [vmem:[%s172_s4 + $0x28] sm:$0xff]  ;;  %v184_v7 = vld [vmem:[%s172_s4 + $0x38] sm:$0xff]  ;;  %s487_s30 = scalar_lea.vmem %s486_s29, 1024  ;;  %p488_p1 = scmp.lt.s32.totalorder %s656_s13, %s486_s29 }
  0x1f   : > { %v410_v8 = vpack.c.bf16 %v179_v5, %v177_v3  ;;  %v412_v9 = vpack.c.bf16 %v184_v7, %v182_v6  ;;  %v181_v10 = vld [vmem:[%s172_s4 + $0x20] sm:$0xff]  ;;  %v183_v11 = vld [vmem:[%s172_s4 + $0x30] sm:$0xff]  ;;  %v186_v13 = vld [vmem:[%s172_s4 + $0x48] sm:$0x1f]  ;;  %p484_p0 = pneg %p483_p13  ;;  %p489_p2 = scmp.lt.s32.totalorder %s487_s30, %s481_s27 }
  0x20   : > { %409 = vmatprep.subr.bf16.mxu0 %v408_v4  ;;  %416 = vmatprep.subr.bf16.mxu1 %v408_v4  ;;  %v414_v12 = vpack.c.bf16 %v183_v11, %v181_v10  ;;  %v185_v14 = vld [vmem:[%s172_s4 + $0x40] sm:$0x1f] }
  0x21   : > { %411 = vmatpush1.bf16.msra.mxu0 %v410_v8  ;;  %419 = vmatpush1.bf16.msra.mxu1 %v410_v8  ;;  %p490_p3 = por %p489_p2, %p488_p1 }
  0x22   : > { %413 = vmatprep.subr.bf16.mxu0 %v412_v9  ;;  %417 = vmatprep.subr.bf16.mxu1 %v412_v9 }
  0x23   : > { %p491_p5 = pnand %p490_p3, %p484_p0 }
  0x25   : > { %415 = vmatpush1.bf16.msra.mxu0 %v414_v12  ;;  %420 = vmatpush1.bf16.msra.mxu1 %v414_v12 }
  0x26   : > { %398 = vmatprep.subr.msk.mxu0 %vm194_vm0, %v186_v13  ;;  %418 = vmatprep.subr.msk.mxu1 %vm194_vm0, %v186_v13 }
  0x29   : > { %399 = vmatpush1.msk.msra.mxu0 %vm194_vm0, %v185_v14  ;;  %421 = vmatpush1.msk.msra.mxu1 %vm194_vm0, %v185_v14 }
  0x2a   : > { %400 = vmatmul.mubr.msk.f32.vlgmr.msra.gmra.mrb[0].mxu0 %vm187_vm1, %v175_v15  ;;  %401 = vmatmul.mubr.msk.f32.vlgmr.msra.gmra.mrb[0].mxu1 %vm187_vm1, %v176_v16 }
  0xfd   : > { %v267_v18 = vpop.f32.mrb[0].mxu0  ;;  %v273_v19 = vpop.f32.mrb[0].mxu1 }
  0xfe   : > { %vm279_vm2 = vcmp.ge.f32.partialorder %v267_v18, 0.0  ;;  %v284_v20 = vmul.f32 %v283_v17, %v267_v18  ;;  %vm281_vm3 = vcmp.ge.f32.partialorder %v273_v19, 0.0  ;;  %v286_v21 = vmul.f32 %v283_v17, %v273_v19  ;;  %v269_v22 = vpop.f32.mrb[1].mxu0  ;;  %v275_v23 = vpop.f32.mrb[1].mxu1 }
  0xff   : > { %vm280_vm4 = vcmp.ge.f32.partialorder %v269_v22, 0.0  ;;  %v285_v24 = vmul.f32 %v283_v17, %v269_v22  ;;  %vm282_vm5 = vcmp.ge.f32.partialorder %v275_v23, 0.0  ;;  %v287_v25 = vmul.f32 %v283_v17, %v275_v23 }
 0x100   : > { %v288_v26 = vsel %vm279_vm2, %v267_v18, %v284_v20  ;;  %v290_v27 = vsel %vm281_vm3, %v273_v19, %v286_v21 }
 0x101   : > { %292 = vst [vmem:[%s163_s12] sm:$0xff] %v288_v26  ;;  %294 = vst [vmem:[%s163_s12 + $0x10] sm:$0xff] %v290_v27  ;;  %v289_v28 = vsel %vm280_vm4, %v269_v22, %v285_v24  ;;  %v291_v29 = vsel %vm282_vm5, %v275_v23, %v287_v25 }
 0x102   : > { %293 = vst [vmem:[%s163_s12 + $0x8] sm:$0xff] %v289_v28  ;;  %295 = vst [vmem:[%s163_s12 + $0x18] sm:$0xff] %v291_v29 }
 0x103   : > { %494 = shalt.err (!%p491_p5)
}
 0x104   : > { %s495_s4 = scalar_lea.hbm %s661_s17, 512  ;;  %s499_s7 = scalar_lea.hbm %s712_s3, 1024 }
 0x105   : > { %p496_p6 = scmp.ne.s32.totalorder %s661_s17, %s495_s4  ;;  %p500_p10 = scmp.lt.u32.totalorder %s661_s17, %s712_s3 }
 0x106   : > { %p501_p11 = scmp.lt.u32.totalorder %s499_s7, %s495_s4  ;;  %p503_p13 = scmp.lt.u32.totalorder %s495_s4, %s661_s17 }
 0x107   : > { %p497_p7 = pnand %p496_p6, %p628_p4 }
 0x108   : > { %p502_p12 = por %p501_p11, %p500_p10 }
 0x109   : > { %p498_p9 = pneg %p497_p7 }
 0x10a   : > { %p504_p0 = por %p503_p13, %p502_p12 }
 0x10c   : > { %p505_p1 = pnand %p504_p0, %p498_p9 }
 0x10e   : > { %508 = shalt.err (!%p505_p1)
}
 0x10f   : > { %s563_s10 = smov 256   ;;  %s564_s11 = smov 16  }
 0x110   : > { %423 = dma.vmem_to_hbm [thread:$0]  (%p628_p4), %s656_s13, 512, %s661_s17, %s663_s24, %s563_s10, %s563_s10, %s564_s11  }
 0x111 PF: > { %p429_p2 = scmp.ge.s32.totalorder %s559_s19, 2  ;;  %s327_s12 = sand.u32 1, %s539_s14  }
 0x112   : > { %s328_s0 = scalar_lea.sflag [#allocation5], %s327_s12 }
 0x113   : > { %p426_p3 = pnand %p429_p2, %p635_p8 }
 0x115   : > { %534 = dma.done.wait (!%p426_p3), %s328_s0, 512  }
 0x116   : > { %536 = vsyncadd (!%p426_p3), %s328_s0, 4294966784  ;;  %s17_s19 = sadd.s32 1, %s559_s19   ;;  %s715_s14 = smov %s543_s15 }
 0x117   : > { %p14_p5 = scmp.ge.s32.totalorder %s17_s19, 4   ;;  %s716_s15 = smov %s547_s16 }
 0x118   : > { %s717_s16 = smov %s641_s26  ;;  %s718_s17 = smov %s555_s18 }
 0x119   : > { %s719_s18 = smov %s721_s21  ;;  %16 = sbr.rel (!%p14_p5) target bundleno = 6 (0x6), region = 63 }
 0x120   :  { %333 = vsyncpa [#allocation5], 1 }
 0x121   :  { %335 = vsyncpa [#allocation5 + $0x1], 1 }

</bundles_post_ra>
